<compile_context>
chip_gen: v7x
topology: tpu7x:2x2x1
jax: 0.10.0
libtpu: 0.0.40
codegen_flags: <defaults>
</compile_context>

<pallas_src>
import functools

import jax
import jax.numpy as jnp
import numpy as np
from jax.experimental import pallas as pl
from jax.experimental.pallas import tpu as pltpu

_BIG = 1e30      # sentinel "infinite" squared distance (padding / accumulator init)
_SLAB = 128      # width of the set-2 slab processed per inner-loop iteration


def _chamfer_kernel(lhs1_ref, rhs1_ref, lhs2_ref, rhs2_ref, d1_ref, d2_ref,
                    *, slab, num_slabs):
    i = pl.program_id(1)

    # dist2 accumulator (min over set-1) stays resident across the i axis.
    @pl.when(i == 0)
    def _():
        d2_ref[0] = jnp.full(d2_ref.shape[1:], _BIG, dtype=jnp.float32)

    # dist1 (min over set-2) is finished entirely within this grid step.
    d1_ref[0] = jnp.full(d1_ref.shape[1:], _BIG, dtype=jnp.float32)

    lhs1 = lhs1_ref[0]          # (tn, 8)  set-1 tile, LHS form
    rhs1 = rhs1_ref[0]          # (8, tn)  set-1 tile, RHS form

    def step(l):
        off = pl.multiple_of(l * slab, slab)

        # Direction 1: for every set-1 point, min over this set-2 slab.
        # (slab, 8) @ (8, tn) -> (slab, tn); sublane-min -> lane-dense (1, tn).
        lhs2 = lhs2_ref[0, pl.ds(off, slab), :]
        d_b = jnp.dot(lhs2, rhs1, preferred_element_type=jnp.float32,
                      precision=jax.lax.Precision.HIGHEST)
        d1_ref[0] = jnp.minimum(d1_ref[0], jnp.min(d_b, axis=0, keepdims=True))

        # Direction 2: for every set-2 point in the slab, min over this set-1
        # tile.  (tn, 8) @ (8, slab) -> (tn, slab); sublane-min -> (1, slab).
        rhs2 = rhs2_ref[0, :, pl.ds(off, slab)]
        d_a = jnp.dot(lhs1, rhs2, preferred_element_type=jnp.float32,
                      precision=jax.lax.Precision.HIGHEST)
        cur = d2_ref[0, :, pl.ds(off, slab)]
        d2_ref[0, :, pl.ds(off, slab)] = jnp.minimum(
            cur, jnp.min(d_a, axis=0, keepdims=True))

    if num_slabs == 1:
        step(0)
    else:
        def body(l, carry):
            step(l)
            return carry
        jax.lax.fori_loop(0, num_slabs, body, 0, unroll=min(num_slabs, 8))

    # L1 Chamfer = sqrt(min squared distance).  Clamp once at the end: the
    # expansion can only go slightly negative when the true min is ~0.
    d1_ref[0] = jnp.sqrt(jnp.maximum(d1_ref[0], 0.0))

    @pl.when(i == pl.num_programs(1) - 1)
    def _():
        d2_ref[0] = jnp.sqrt(jnp.maximum(d2_ref[0], 0.0))


def _pad_axis1(x, multiple):
    n = x.shape[1]
    target = ((n + multiple - 1) // multiple) * multiple
    if target == n:
        return x
    pad = [(0, 0)] * x.ndim
    pad[1] = (0, target - n)
    return jnp.pad(x, pad)


def _augment(xyz, pad_multiple):
    """Augmented LHS (B,Np,8) and RHS (B,8,Np) forms of a (padded) cloud."""
    n_valid = xyz.shape[1]
    xyz = _pad_axis1(xyz.astype(jnp.float32), pad_multiple)
    B, Np, _ = xyz.shape
    sq = jnp.sum(xyz * xyz, axis=-1, keepdims=True)                # (B, Np, 1)
    valid = (jnp.arange(Np) < n_valid)[None, :, None]
    norm = jnp.where(valid, sq, _BIG)                              # pad -> BIG
    ones = jnp.ones_like(sq)
    zeros = jnp.zeros((B, Np, 3), jnp.float32)
    lhs = jnp.concatenate([xyz, ones, norm, zeros], axis=-1)       # (B, Np, 8)
    rhs = jnp.swapaxes(
        jnp.concatenate([-2.0 * xyz, norm, ones, zeros], axis=-1), 1, 2)  # (B,8,Np)
    return lhs, rhs


def _chamfer_min_dists(xyz1, xyz2, *, tn=128):
    """Returns (sqrt min_j |p_i-q_j|^2, sqrt min_i |p_i-q_j|^2): (B,N1),(B,N2)."""
    B, N1, _ = xyz1.shape
    _, N2, _ = xyz2.shape
    lhs1, rhs1 = _augment(xyz1, tn)
    lhs2, rhs2 = _augment(xyz2, _SLAB)
    Np1 = lhs1.shape[1]
    Np2 = lhs2.shape[1]
    slab = _SLAB
    num_slabs = Np2 // slab

    kernel = functools.partial(_chamfer_kernel, slab=slab, num_slabs=num_slabs)
    d1, d2 = pl.pallas_call(
        kernel,
        out_shape=(jax.ShapeDtypeStruct((B, 1, Np1), jnp.float32),
                   jax.ShapeDtypeStruct((B, 1, Np2), jnp.float32)),
        grid_spec=pltpu.PrefetchScalarGridSpec(
            num_scalar_prefetch=0,
            grid=(B, Np1 // tn),
            in_specs=[
                pl.BlockSpec((1, tn, 8), lambda b, i: (b, i, 0)),   # set-1 LHS tile
                pl.BlockSpec((1, 8, tn), lambda b, i: (b, 0, i)),   # set-1 RHS tile
                pl.BlockSpec((1, Np2, 8), lambda b, i: (b, 0, 0)),  # set-2 LHS (resident)
                pl.BlockSpec((1, 8, Np2), lambda b, i: (b, 0, 0)),  # set-2 RHS (resident)
            ],
            out_specs=[
                pl.BlockSpec((1, 1, tn), lambda b, i: (b, 0, i)),   # dist1 rows
                pl.BlockSpec((1, 1, Np2), lambda b, i: (b, 0, 0)),  # dist2 accumulator
            ],
        ),
        compiler_params=pltpu.CompilerParams(
            dimension_semantics=("parallel", "arbitrary")),
    )(lhs1, rhs1, lhs2, rhs2)
    return d1[:, 0, :N1], d2[:, 0, :N2]


def chamfer_distance_l1(xyz1, xyz2, weights1=None, weights2=None,
                        ignore_zeros=False):
    """Mirrors ChamferDistanceL1.forward (PyTorch) for static-shape inputs."""
    # TODO(synk): ignore_zeros (batch==1 boolean compaction) needs dynamic
    # shapes and has no static-shape JAX/Pallas equivalent; it is skipped.
    del ignore_zeros

    dist1, dist2 = _chamfer_min_dists(xyz1, xyz2)   # (B, N1), (B, N2)

    if weights1 is not None:
        w1 = weights1[..., 0] if (weights1.ndim == 3 and weights1.shape[2] == 1) else weights1
        dist1 = dist1 * w1
        dist1_avg = jnp.sum(dist1) / jnp.sum(weights1)
    else:
        dist1_avg = jnp.mean(dist1)

    if weights2 is not None:
        w2 = weights2[..., 0] if (weights2.ndim == 3 and weights2.shape[2] == 1) else weights2
        dist2 = dist2 * w2
        dist2_avg = jnp.sum(dist2) / jnp.sum(weights2)
    else:
        dist2_avg = jnp.mean(dist2)

    return (dist1_avg + dist2_avg) / 2


def _chamfer_ref(xyz1, xyz2, weights1=None, weights2=None):
    """Pure-JAX reference for correctness checking."""
    d = jnp.sum((xyz1[:, :, None, :] - xyz2[:, None, :, :]) ** 2, axis=-1)
    dist1 = jnp.sqrt(jnp.min(d, axis=2))
    dist2 = jnp.sqrt(jnp.min(d, axis=1))
    if weights1 is not None:
        d1 = jnp.sum(dist1 * weights1) / jnp.sum(weights1)
    else:
        d1 = jnp.mean(dist1)
    if weights2 is not None:
        d2 = jnp.sum(dist2 * weights2) / jnp.sum(weights2)
    else:
        d2 = jnp.mean(dist2)
    return (d1 + d2) / 2


if __name__ == "__main__":
    key = jax.random.PRNGKey(0)
    k1, k2, k3, k4, k5, k6 = jax.random.split(key, 6)

    # exact-tile case
    B, N1, N2 = 2, 128, 128
    xyz1 = jax.random.normal(k1, (B, N1, 3), dtype=jnp.float32)
    xyz2 = jax.random.normal(k2, (B, N2, 3), dtype=jnp.float32)
    w1 = jax.random.uniform(k3, (B, N1), dtype=jnp.float32) + 0.1
    w2 = jax.random.uniform(k4, (B, N2), dtype=jnp.float32) + 0.1

    out = jax.block_until_ready(chamfer_distance_l1(xyz1, xyz2))
    ref = jax.block_until_ready(_chamfer_ref(xyz1, xyz2))
    assert np.allclose(np.asarray(out), np.asarray(ref), rtol=1e-4, atol=1e-5), (out, ref)

    out_w = jax.block_until_ready(chamfer_distance_l1(xyz1, xyz2, w1, w2))
    ref_w = jax.block_until_ready(_chamfer_ref(xyz1, xyz2, w1, w2))
    assert np.allclose(np.asarray(out_w), np.asarray(ref_w), rtol=1e-4, atol=1e-5), (out_w, ref_w)

    # ragged case (exercises the padding / sentinel-mask path)
    M1, M2 = 100, 150
    a = jax.random.normal(k5, (1, M1, 3), dtype=jnp.float32)
    b = jax.random.normal(k6, (1, M2, 3), dtype=jnp.float32)
    out_r = jax.block_until_ready(chamfer_distance_l1(a, b))
    ref_r = jax.block_until_ready(_chamfer_ref(a, b))
    assert np.allclose(np.asarray(out_r), np.asarray(ref_r), rtol=1e-4, atol=1e-5), (out_r, ref_r)

    print("KERNEL_OK")
</pallas_src>

<mosaic_0001>
module attributes {stable_mosaic.version = 11 : i64} {
  func.func @_chamfer_kernel(%arg0: i32, %arg1: i32, %arg2: memref<1x128x8xf32, #tpu.memory_space<vmem>>, %arg3: memref<1x8x128xf32, #tpu.memory_space<vmem>>, %arg4: memref<1x128x8xf32, #tpu.memory_space<vmem>>, %arg5: memref<1x8x128xf32, #tpu.memory_space<vmem>>, %arg6: memref<1x1x128xf32, #tpu.memory_space<vmem>>, %arg7: memref<1x1x128xf32, #tpu.memory_space<vmem>>) attributes {dimension_semantics = [#tpu.dimension_semantics<parallel>, #tpu.dimension_semantics<arbitrary>], iteration_bounds = array<i64: 2, 1>, scalar_prefetch = 0 : i64, scratch_operands = 0 : i64, tpu.core_type = #tpu.core_type<tc>, window_params = [{transform_indices = @transform_0, window_bounds = array<i64: 1, 128, 8>}, {transform_indices = @transform_1, window_bounds = array<i64: 1, 8, 128>}, {transform_indices = @transform_2, window_bounds = array<i64: 1, 128, 8>}, {transform_indices = @transform_3, window_bounds = array<i64: 1, 8, 128>}, {transform_indices = @transform_4, window_bounds = array<i64: 1, 1, 128>}, {transform_indices = @transform_5, window_bounds = array<i64: 1, 1, 128>}]} {
    %c0_i32 = arith.constant 0 : i32
    %0 = arith.cmpi eq, %arg1, %c0_i32 : i32
    %1 = arith.extui %0 : i1 to i32
    %c0_i32_0 = arith.constant 0 : i32
    %2 = arith.cmpi ne, %1, %c0_i32_0 : i32
    scf.if %2 {
      %cst_37 = arith.constant 1.000000e+30 : f32
      %49 = vector.broadcast %cst_37 : f32 to vector<1x128xf32>
      %c0_38 = arith.constant 0 : index
      %c0_39 = arith.constant 0 : index
      %c0_40 = arith.constant 0 : index
      %50 = vector.load %arg7[%c0_38, %c0_39, %c0_40] : memref<1x1x128xf32, #tpu.memory_space<vmem>>, vector<1x1x128xf32>
      %51 = vector.shape_cast %50 : vector<1x1x128xf32> to vector<1x128xf32>
      %52 = vector.shape_cast %49 : vector<1x128xf32> to vector<1x1x128xf32>
      tpu.vector_store %arg7[%c0_38, %c0_39, %c0_40], %52 {strides = array<i32>} : memref<1x1x128xf32, #tpu.memory_space<vmem>>, vector<1x1x128xf32>,
    } else {
    }
    %cst = arith.constant 1.000000e+30 : f32
    %3 = vector.broadcast %cst : f32 to vector<1x128xf32>
    %c0 = arith.constant 0 : index
    %c0_1 = arith.constant 0 : index
    %c0_2 = arith.constant 0 : index
    %4 = vector.load %arg6[%c0, %c0_1, %c0_2] : memref<1x1x128xf32, #tpu.memory_space<vmem>>, vector<1x1x128xf32>
    %5 = vector.shape_cast %4 : vector<1x1x128xf32> to vector<1x128xf32>
    %6 = vector.shape_cast %3 : vector<1x128xf32> to vector<1x1x128xf32>
    tpu.vector_store %arg6[%c0, %c0_1, %c0_2], %6 {strides = array<i32>} : memref<1x1x128xf32, #tpu.memory_space<vmem>>, vector<1x1x128xf32>,
    %c0_3 = arith.constant 0 : index
    %c0_4 = arith.constant 0 : index
    %c0_5 = arith.constant 0 : index
    %7 = vector.load %arg2[%c0_3, %c0_4, %c0_5] : memref<1x128x8xf32, #tpu.memory_space<vmem>>, vector<1x128x8xf32>
    %8 = vector.shape_cast %7 : vector<1x128x8xf32> to vector<128x8xf32>
    %c0_6 = arith.constant 0 : index
    %c0_7 = arith.constant 0 : index
    %c0_8 = arith.constant 0 : index
    %9 = vector.load %arg3[%c0_6, %c0_7, %c0_8] : memref<1x8x128xf32, #tpu.memory_space<vmem>>, vector<1x8x128xf32>
    %10 = vector.shape_cast %9 : vector<1x8x128xf32> to vector<8x128xf32>
    %c0_i32_9 = arith.constant 0 : i32
    %11 = tpu.assume_multiple %c0_i32_9, 128 : i32
    %c0_10 = arith.constant 0 : index
    %12 = arith.index_cast %11 : i32 to index
    %c0_11 = arith.constant 0 : index
    %13 = vector.load %arg4[%c0_10, %12, %c0_11] : memref<1x128x8xf32, #tpu.memory_space<vmem>>, vector<1x128x8xf32>
    %14 = vector.shape_cast %13 : vector<1x128x8xf32> to vector<128x8xf32>
    %cst_12 = arith.constant dense<0.000000e+00> : vector<128x128xf32>
    %15 = tpu.matmul %14, %10, %cst_12 {dimension_numbers = #tpu.dot_dimension_numbers<[1], [0], [0], [1], [0, 0, 1, 1], [], []>, precision = #tpu.contract_precision<fp32>} : vector<128x8xf32>, vector<8x128xf32>, vector<128x128xf32> -> vector<128x128xf32>
    %c0_13 = arith.constant 0 : index
    %c0_14 = arith.constant 0 : index
    %c0_15 = arith.constant 0 : index
    %16 = vector.load %arg6[%c0_13, %c0_14, %c0_15] : memref<1x1x128xf32, #tpu.memory_space<vmem>>, vector<1x1x128xf32>
    %17 = vector.shape_cast %16 : vector<1x1x128xf32> to vector<1x128xf32>
    %cst_16 = arith.constant dense<0x7F800000> : vector<128xf32>
    %18 = vector.multi_reduction <minimumf>, %15, %cst_16 [0] : vector<128x128xf32> to vector<128xf32>
    %19 = vector.shape_cast %18 : vector<128xf32> to vector<1x128xf32>
    %20 = arith.minimumf %17, %19 : vector<1x128xf32>
    %c0_17 = arith.constant 0 : index
    %c0_18 = arith.constant 0 : index
    %c0_19 = arith.constant 0 : index
    %21 = vector.load %arg6[%c0_17, %c0_18, %c0_19] : memref<1x1x128xf32, #tpu.memory_space<vmem>>, vector<1x1x128xf32>
    %22 = vector.shape_cast %21 : vector<1x1x128xf32> to vector<1x128xf32>
    %23 = vector.shape_cast %20 : vector<1x128xf32> to vector<1x1x128xf32>
    tpu.vector_store %arg6[%c0_17, %c0_18, %c0_19], %23 {strides = array<i32>} : memref<1x1x128xf32, #tpu.memory_space<vmem>>, vector<1x1x128xf32>,
    %c0_20 = arith.constant 0 : index
    %c0_21 = arith.constant 0 : index
    %24 = arith.index_cast %11 : i32 to index
    %25 = vector.load %arg5[%c0_20, %c0_21, %24] : memref<1x8x128xf32, #tpu.memory_space<vmem>>, vector<1x8x128xf32>
    %26 = vector.shape_cast %25 : vector<1x8x128xf32> to vector<8x128xf32>
    %cst_22 = arith.constant dense<0.000000e+00> : vector<128x128xf32>
    %27 = tpu.matmul %8, %26, %cst_22 {dimension_numbers = #tpu.dot_dimension_numbers<[1], [0], [0], [1], [0, 0, 1, 1], [], []>, precision = #tpu.contract_precision<fp32>} : vector<128x8xf32>, vector<8x128xf32>, vector<128x128xf32> -> vector<128x128xf32>
    %c0_23 = arith.constant 0 : index
    %c0_24 = arith.constant 0 : index
    %28 = arith.index_cast %11 : i32 to index
    %29 = vector.load %arg7[%c0_23, %c0_24, %28] : memref<1x1x128xf32, #tpu.memory_space<vmem>>, vector<1x1x128xf32>
    %30 = vector.shape_cast %29 : vector<1x1x128xf32> to vector<1x128xf32>
    %cst_25 = arith.constant dense<0x7F800000> : vector<128xf32>
    %31 = vector.multi_reduction <minimumf>, %27, %cst_25 [0] : vector<128x128xf32> to vector<128xf32>
    %32 = vector.shape_cast %31 : vector<128xf32> to vector<1x128xf32>
    %33 = arith.minimumf %30, %32 : vector<1x128xf32>
    %c0_26 = arith.constant 0 : index
    %c0_27 = arith.constant 0 : index
    %34 = arith.index_cast %11 : i32 to index
    %35 = vector.load %arg7[%c0_26, %c0_27, %34] : memref<1x1x128xf32, #tpu.memory_space<vmem>>, vector<1x1x128xf32>
    %36 = vector.shape_cast %35 : vector<1x1x128xf32> to vector<1x128xf32>
    %37 = vector.shape_cast %33 : vector<1x128xf32> to vector<1x1x128xf32>
    tpu.vector_store %arg7[%c0_26, %c0_27, %34], %37 {strides = array<i32>} : memref<1x1x128xf32, #tpu.memory_space<vmem>>, vector<1x1x128xf32>,
    %c0_28 = arith.constant 0 : index
    %c0_29 = arith.constant 0 : index
    %c0_30 = arith.constant 0 : index
    %38 = vector.load %arg6[%c0_28, %c0_29, %c0_30] : memref<1x1x128xf32, #tpu.memory_space<vmem>>, vector<1x1x128xf32>
    %39 = vector.shape_cast %38 : vector<1x1x128xf32> to vector<1x128xf32>
    %cst_31 = arith.constant 0.000000e+00 : f32
    %40 = vector.broadcast %cst_31 : f32 to vector<1x128xf32>
    %41 = arith.maximumf %39, %40 : vector<1x128xf32>
    %42 = math.sqrt %41 : vector<1x128xf32>
    %c0_32 = arith.constant 0 : index
    %c0_33 = arith.constant 0 : index
    %c0_34 = arith.constant 0 : index
    %43 = vector.load %arg6[%c0_32, %c0_33, %c0_34] : memref<1x1x128xf32, #tpu.memory_space<vmem>>, vector<1x1x128xf32>
    %44 = vector.shape_cast %43 : vector<1x1x128xf32> to vector<1x128xf32>
    %45 = vector.shape_cast %42 : vector<1x128xf32> to vector<1x1x128xf32>
    tpu.vector_store %arg6[%c0_32, %c0_33, %c0_34], %45 {strides = array<i32>} : memref<1x1x128xf32, #tpu.memory_space<vmem>>, vector<1x1x128xf32>,
    %c0_i32_35 = arith.constant 0 : i32
    %46 = arith.cmpi eq, %arg1, %c0_i32_35 : i32
    %47 = arith.extui %46 : i1 to i32
    %c0_i32_36 = arith.constant 0 : i32
    %48 = arith.cmpi ne, %47, %c0_i32_36 : i32
    scf.if %48 {
      %c0_37 = arith.constant 0 : index
      %c0_38 = arith.constant 0 : index
      %c0_39 = arith.constant 0 : index
      %49 = vector.load %arg7[%c0_37, %c0_38, %c0_39] : memref<1x1x128xf32, #tpu.memory_space<vmem>>, vector<1x1x128xf32>
      %50 = vector.shape_cast %49 : vector<1x1x128xf32> to vector<1x128xf32>
      %cst_40 = arith.constant 0.000000e+00 : f32
      %51 = vector.broadcast %cst_40 : f32 to vector<1x128xf32>
      %52 = arith.maximumf %50, %51 : vector<1x128xf32>
      %53 = math.sqrt %52 : vector<1x128xf32>
      %c0_41 = arith.constant 0 : index
      %c0_42 = arith.constant 0 : index
      %c0_43 = arith.constant 0 : index
      %54 = vector.load %arg7[%c0_41, %c0_42, %c0_43] : memref<1x1x128xf32, #tpu.memory_space<vmem>>, vector<1x1x128xf32>
      %55 = vector.shape_cast %54 : vector<1x1x128xf32> to vector<1x128xf32>
      %56 = vector.shape_cast %53 : vector<1x128xf32> to vector<1x1x128xf32>
      tpu.vector_store %arg7[%c0_41, %c0_42, %c0_43], %56 {strides = array<i32>} : memref<1x1x128xf32, #tpu.memory_space<vmem>>, vector<1x1x128xf32>,
    } else {
    }
    return
  }
  func.func @transform_0(%arg0: i32, %arg1: i32) -> (i32, i32, i32) {
    %c0_i32 = arith.constant 0 : i32
    %c0_i32_0 = arith.constant 0 : i32
    return %arg0, %arg1, %c0_i32 : i32, i32, i32
  }
  func.func @transform_1(%arg0: i32, %arg1: i32) -> (i32, i32, i32) {
    %c0_i32 = arith.constant 0 : i32
    %c0_i32_0 = arith.constant 0 : i32
    return %arg0, %c0_i32, %arg1 : i32, i32, i32
  }
  func.func @transform_2(%arg0: i32, %arg1: i32) -> (i32, i32, i32) {
    %c0_i32 = arith.constant 0 : i32
    %c0_i32_0 = arith.constant 0 : i32
    %c0_i32_1 = arith.constant 0 : i32
    return %arg0, %c0_i32, %c0_i32_0 : i32, i32, i32
  }
  func.func @transform_3(%arg0: i32, %arg1: i32) -> (i32, i32, i32) {
    %c0_i32 = arith.constant 0 : i32
    %c0_i32_0 = arith.constant 0 : i32
    %c0_i32_1 = arith.constant 0 : i32
    return %arg0, %c0_i32, %c0_i32_0 : i32, i32, i32
  }
  func.func @transform_4(%arg0: i32, %arg1: i32) -> (i32, i32, i32) {
    %c0_i32 = arith.constant 0 : i32
    %c0_i32_0 = arith.constant 0 : i32
    return %arg0, %c0_i32, %arg1 : i32, i32, i32
  }
  func.func @transform_5(%arg0: i32, %arg1: i32) -> (i32, i32, i32) {
    %c0_i32 = arith.constant 0 : i32
    %c0_i32_0 = arith.constant 0 : i32
    %c0_i32_1 = arith.constant 0 : i32
    return %arg0, %c0_i32, %c0_i32_0 : i32, i32, i32
  }
}

</mosaic_0001>

<bundles_post_ra>
// kernel: tpu_custom_call.1
= control target key start
LH: loop header
LB: loop body
LE: loop exit
PB: predicated region body
PF: predicated region fallthrough
CT: control target
= control target key end

     0   :  { %11 = vsyncpa [#allocation3], 0  ;;  %s4547_s0 = inlined_call_operand.vmem [shape: f32[2,128,8], index: 0, kind: input, shape index: {}]   ;;  %s4548_s1 = inlined_call_operand.vmem [shape: f32[2,8,128], index: 1, kind: input, shape index: {}]   ;;  %s4549_s2 = inlined_call_operand.vmem [shape: f32[2,128,8], index: 2, kind: input, shape index: {}]   ;;  %s4550_s3 = inlined_call_operand.vmem [shape: f32[2,8,128], index: 3, kind: input, shape index: {}]   ;;  %s4551_s4 = inlined_call_operand.hbm [shape: f32[2,1,128], index: 4, kind: output, shape index: {0}]   ;;  %s4552_s5 = inlined_call_operand.hbm [shape: f32[2,1,128], index: 5, kind: output, shape index: {1}]  }
   0x1   :  { %13 = vsyncpa [#allocation3 + $0x1], 0 }
   0x2   :  { %14 = vsyncpa [#allocation5], 0 }
   0x3   :  { %16 = vsyncpa [#allocation5 + $0x1], 0  ;;  %s3788_s18 = smov 0   ;;  %s3790_s19 = smov 0  }
   0x4   :  { %s3792_s20 = smov 0   ;;  %s3794_s21 = smov 0  }
   0x5   :  { %s3796_s22 = smov 0   ;;  %s3798_s23 = smov 0  }
   0x6 LB: > { %s2885_s24 = sadd.s32 4294967295, %s3753_s23   ;;  %s2886_s25 = sadd.s32 4294967294, %s3753_s23   ;;  %s3753_s23 = sphi %s3798_s23, %s22_s23   ;;  %s3749_s22 = sphi %s3796_s22, %s4735_s22   ;;  %s3745_s21 = sphi %s3794_s21, %s4734_s21   ;;  %s3741_s20 = sphi %s3792_s20, %s4733_s20   ;;  %s3737_s19 = sphi %s3790_s19, %s4732_s19   ;;  %s3733_s18 = sphi %s3788_s18, %s4731_s18  }
   0x7   : > { %s34_s26 = sadd.s32 1, %s3749_s22  ;;  %s151_s27 = sadd.s32 1, %s3741_s20 }
   0x8   : > { %p36_p0 = scmp.ge.s32.totalorder %s34_s26, 2  ;;  %p161_p1 = scmp.ne.s32.totalorder %s3741_s20, %s3737_s19 }
   0x9   : > { %p162_p2 = scmp.eq.s32.totalorder %s2885_s24, 1  ;;  %p167_p3 = scmp.ne.s32.totalorder %s3737_s19, %s3733_s18 }
   0xa   : > { %s4737_s26 = smov (%p36_p0, %s34_s26), 0  ;;  %p168_p5 = scmp.eq.s32.totalorder %s2886_s25, 1 }
   0xb   : > { %p3828_p4 = por %p162_p2, %p161_p1  ;;  %s146_s29 = ssub.s32 %s3749_s22, %s4737_s26 }
   0xc   : > { %p2889_p6 = scmp.ge.s32.totalorder %s3753_s23, 1  ;;  %p149_p7 = scmp.eq.s32.totalorder %s146_s29, 0 }
   0xd   : > { %p3835_p8 = por %p168_p5, %p167_p3  ;;  %p250_p9 = scmp.lt.s32.totalorder %s3753_s23, 3 }
   0xe   : > { %s3841_s6 = scalar_select %p149_p7, %s3741_s20, %s151_s27  }
   0xf   : > { %p251_p10 = pnand %p2889_p6, %p250_p9 }
  0x11   : > { %254 = sbr.rel (%p251_p10) target bundleno = 542 (0x21e), region = 36 }
  0x18   : > { %p302_p11 = scmp.lt.s32.totalorder %s3745_s21, 1  ;;  %vm366_vm0 = vcmask 64512   ;;  %s2896_s10 = sshll.u32 %s3745_s21, 4 }
  0x19   : > { %s4475_s17 = scalar_lea.hbm %s4552_s5, %s2896_s10  ;;  %s3756_s27 = smov [#allocation2]  }
  0x1a   : > { %s303_s7 = scalar_select %p302_p11, %s3745_s21, 1 }
  0x1c   : > { %s2900_s8 = sshll.u32 %s303_s7, 7  ;;  %s2892_s9 = sshll.u32 %s303_s7, 3 }
  0x1d   : > { %s3848_s12 = scalar_lea.vmem %s4547_s0, %s2900_s8  ;;  %s317_s15 = scalar_lea.vmem %s4548_s1, %s2892_s9 }
  0x1e   : > { %s3856_s24 = scalar_lea.vmem %s4549_s2, %s2900_s8  ;;  %v349_v0 = vld [vmem:[%s317_s15] sm:$0xff]  ;;  %s326_s29 = scalar_lea.vmem %s4550_s3, %s2892_s9  ;;  %v334_v2 = vld [vmem:[%s3848_s12 + $0x8] sm:$0xff]  ;;  %v335_v14 = vld [vmem:[%s3848_s12 + $0x10] sm:$0xff] }
  0x1f   : > { %v333_v1 = vld [vmem:[%s3848_s12] sm:$0xff]  ;;  %v3863_v3 = vand.u32 4294901760, %v349_v0  ;;  %v351_v7 = vld [vmem:[%s3856_s24 + $0x8] sm:$0xff]  ;;  %v1535_v8 = vsel %vm366_vm0, %v334_v2, 0  ;;  %v352_v13 = vld [vmem:[%s3856_s24 + $0x10] sm:$0xff]  ;;  %v1538_v22 = vsel %vm366_vm0, %v335_v14, 0  ;;  %s4468_s15 = scalar_lea.hbm %s4551_s4, %s2896_s10 }
  0x20   : > { %v1530_v4 = vld [vmem:[%s326_s29] sm:$0xff]  ;;  %v1532_v6 = vsel %vm366_vm0, %v333_v1, 0  ;;  %v371_v12 = vsel %vm366_vm0, %v351_v7, 0  ;;  %v3885_v18 = vand.u32 4294901760, %v1535_v8  ;;  %v374_v21 = vsel %vm366_vm0, %v352_v13, 0  ;;  %v353_v39 = vld [vmem:[%s3856_s24 + $0x18] sm:$0xff] }
  0x21   : > { %v350_v5 = vld [vmem:[%s3856_s24] sm:$0xff]  ;;  %v3869_v9 = vand.u32 4294901760, %v1530_v4  ;;  %v3872_v11 = vand.u32 4294901760, %v1532_v6  ;;  %3106 = vmatprep.subr.mxu0 %v3863_v3  ;;  %v3881_v16 = vsub.f32 %v349_v0, %v3863_v3  ;;  %v3883_v17 = vand.u32 4294901760, %v371_v12  ;;  %v336_v44 = vld [vmem:[%s3848_s12 + $0x18] sm:$0xff]  ;;  %v355_v51 = vld [vmem:[%s3856_s24 + $0x28] sm:$0xff] }
  0x22   : > { %v368_v10 = vsel %vm366_vm0, %v350_v5, 0  ;;  %3107 = vmatpush3.msra.mxu0 %v3863_v3  ;;  %v3908_v26 = vsub.f32 %v1535_v8, %v3885_v18  ;;  %v3914_v29 = vand.u32 4294901760, %v374_v21  ;;  %v3916_v30 = vand.u32 4294901760, %v1538_v22  ;;  %v354_v45 = vld [vmem:[%s3856_s24 + $0x20] sm:$0xff]  ;;  %v338_v60 = vld [vmem:[%s3848_s12 + $0x28] sm:$0xff]  ;;  %v356_v1 = vld [vmem:[%s3856_s24 + $0x30] sm:$0xff] }
  0x23   : > { %v3878_v15 = vand.u32 4294901760, %v368_v10  ;;  %3262 = vmatprep.subr.mxu1 %v3869_v9  ;;  %v3890_v19 = vsub.f32 %v1532_v6, %v3872_v11  ;;  %v3893_v20 = vsub.f32 %v1530_v4, %v3869_v9  ;;  %v3902_v24 = vand.u32 4294901760, %v3881_v16  ;;  %v337_v50 = vld [vmem:[%s3848_s12 + $0x20] sm:$0xff]  ;;  %v339_v13 = vld [vmem:[%s3848_s12 + $0x30] sm:$0xff]  ;;  %s4446_s7 = sand.u32 1, %s3737_s19   ;;  %s3647_s29 = sshll.u32 %s3756_s27, 4  ;;  %s3648_s29 = int_to_ptr.vmem [resolvable:$false] %s3647_s29 }
  0x24   : > { %3263 = vmatpush3.msra.mxu1 %v3869_v9  ;;  %v3905_v25 = vsub.f32 %v371_v12, %v3883_v17  ;;  %v4564_v34 = vand.u32 4294901760, %v3908_v26  ;;  %v3929_v37 = vsub.f32 %v374_v21, %v3914_v29  ;;  %v3932_v38 = vsub.f32 %v1538_v22, %v3916_v30  ;;  %s4449_s8 = scalar_lea.vmem [#allocation2], %s4446_s7  ;;  %s4453_s9 = scalar_lea.vmem [#allocation4], %s4446_s7 }
  0x25   : > { %v3899_v23 = vsub.f32 %v368_v10, %v3878_v15  ;;  %v4567_v27 = vand.u32 4294901760, %v3890_v19  ;;  %v3912_v28 = vand.u32 4294901760, %v3893_v20  ;;  %v645_v32 = vsub.f32 %v3881_v16, %v3902_v24  ;;  %s2735_s11 = sshll.u32 %s4449_s8, 4  ;;  %s3649_s13 = scalar_lea.vmem %s3648_s29, 32  ;;  %s4470_s11 = int_to_ptr.vmem [resolvable:$true] %s2735_s11 }
  0x26   : > { %v4565_v33 = vand.u32 4294901760, %v3905_v25  ;;  %v1658_v43 = vsub.f32 %v3908_v26, %v4564_v34  ;;  %v4563_v48 = vand.u32 4294901760, %v3929_v37  ;;  %v4562_v49 = vand.u32 4294901760, %v3932_v38  ;;  %s3643_s25 = scalar_lea.vmem %s4470_s11, 16  ;;  %p3650_p1 = scmp.lt.s32.totalorder %s4470_s11, %s3648_s29 }
  0x27   : > { %v4569_v31 = vand.u32 4294901760, %v3899_v23  ;;  %v1648_v35 = vsub.f32 %v3890_v19, %v4567_v27  ;;  %v1809_v36 = vsub.f32 %v3893_v20, %v3912_v28  ;;  %v646_v41 = vand.u32 4294901760, %v645_v32  ;;  %p3644_p12 = scmp.ne.s32.totalorder %s4470_s11, %s3643_s25  ;;  %p3651_p2 = scmp.lt.s32.totalorder %s3649_s13, %s3643_s25 }
  0x28   : > { %v494_v42 = vsub.f32 %v3905_v25, %v4565_v33  ;;  %v1659_v54 = vand.u32 4294901760, %v1658_v43  ;;  %v377_v55 = vsel %vm366_vm0, %v353_v39, 0  ;;  %v504_v56 = vsub.f32 %v3929_v37, %v4563_v48  ;;  %v362_v33 = vld [vmem:[%s3856_s24 + $0x60] sm:$0xff] }
  0x29   : > { %v484_v40 = vsub.f32 %v3899_v23, %v4569_v31  ;;  %v1649_v46 = vand.u32 4294901760, %v1648_v35  ;;  %v1810_v47 = vand.u32 4294901760, %v1809_v36  ;;  %3132 = vmatprep.subr.mxu0 %v646_v41  ;;  %v1668_v57 = vsub.f32 %v3932_v38, %v4562_v49  ;;  %p3645_p13 = pnand %p3644_p12, %p3828_p4  ;;  %p3652_p3 = por %p3651_p2, %p3650_p1 }
  0x2a   : > { %v495_v53 = vand.u32 4294901760, %v494_v42  ;;  %v3957_v58 = vand.u32 4294901760, %v377_v55  ;;  %v1541_v59 = vsel %vm366_vm0, %v336_v44, 0  ;;  %v380_v62 = vsel %vm366_vm0, %v354_v45, 0 }
  0x2b   : > { %v485_v52 = vand.u32 4294901760, %v484_v40  ;;  %3264 = vmatprep.mubr.f32.mxu1 %v1649_v46  ;;  %3288 = vmatprep.subr.mxu1 %v1810_v47  ;;  %v3961_v61 = vand.u32 4294901760, %v1541_v59  ;;  %v1544_v63 = vsel %vm366_vm0, %v337_v50, 0  ;;  %v383_v0 = vsel %vm366_vm0, %v355_v51, 0  ;;  %v357_v51 = vld [vmem:[%s3856_s24 + $0x38] sm:$0xff]  ;;  %p3646_p0 = pneg %p3645_p13 }
  0x2c   : > { %3265 = vmatmul.mubr.f32.vlgmr.msra.gmra.mrb[0].mxu1 %v1659_v54  ;;  %v505_v2 = vand.u32 4294901760, %v504_v56  ;;  %v1669_v4 = vand.u32 4294901760, %v1668_v57  ;;  %v3968_v5 = vsub.f32 %v377_v55, %v3957_v58  ;;  %v3970_v6 = vand.u32 4294901760, %v380_v62 }
  0x2d   : > { %3108 = vmatprep.mubr.f32.mxu0 %v485_v52  ;;  %3289 = vmatpush3.msra.mxu1 %v1810_v47  ;;  %v3973_v7 = vsub.f32 %v1541_v59, %v3961_v61  ;;  %v3975_v8 = vand.u32 4294901760, %v1544_v63  ;;  %v3977_v10 = vand.u32 4294901760, %v383_v0  ;;  %v1547_v12 = vsel %vm366_vm0, %v338_v60, 0  ;;  %p3653_p5 = pnand %p3652_p3, %p3646_p0 }
  0x2e   : > { %3109 = vmatmul.mubr.f32.vlgmr.msra.gmra.mrb[0].mxu0 %v495_v53  ;;  %3314 = vmatprep.subr.mxu1 %v3893_v20  ;;  %v4561_v14 = vand.u32 4294901760, %v3968_v5  ;;  %v3984_v21 = vsub.f32 %v380_v62, %v3970_v6  ;;  %v3986_v22 = vand.u32 4294901760, %v1547_v12  ;;  %v386_v32 = vsel %vm366_vm0, %v356_v1, 0  ;;  %v340_v62 = vld [vmem:[%s3848_s12 + $0x38] sm:$0xff] }
  0x2f   : > { %3133 = vmatpush3.msra.mxu0 %v646_v41  ;;  %3111 = vmatprep.mubr.f32.mxu0 %v505_v2  ;;  %v4559_v35 = vand.u32 4294901760, %v3973_v7  ;;  %v3991_v36 = vsub.f32 %v1544_v63, %v3975_v8  ;;  %v3994_v39 = vsub.f32 %v383_v0, %v3977_v10  ;;  %v3996_v40 = vand.u32 4294901760, %v386_v32  ;;  %v358_v63 = vld [vmem:[%s3856_s24 + $0x40] sm:$0xff] }
  0x30   : > { %3267 = vmatprep.mubr.f32.mxu1 %v1669_v4  ;;  %4642 = vst [vmem:[#allocation8_spill] sm:$0xff] %v3984_v21  ;;  %3158 = vmatprep.subr.mxu0 %v3881_v16  ;;  %v514_v41 = vsub.f32 %v3968_v5, %v4561_v14  ;;  %v4558_v42 = vand.u32 4294901760, %v3984_v21  ;;  %v4004_v43 = vsub.f32 %v1547_v12, %v3986_v22  ;;  %v1550_v44 = vsel %vm366_vm0, %v339_v13, 0  ;;  %v361_v14 = vld [vmem:[%s3856_s24 + $0x58] sm:$0xff] }
  0x31   : > { %4643 = vst [vmem:[#allocation9_spill] sm:$0xff] %v3991_v36  ;;  %4644 = vst [vmem:[#allocation10_spill] sm:$0xff] %v3994_v39  ;;  %v1678_v45 = vsub.f32 %v3973_v7, %v4559_v35  ;;  %v4556_v46 = vand.u32 4294901760, %v3991_v36  ;;  %v4554_v47 = vand.u32 4294901760, %v3994_v39  ;;  %v4013_v50 = vsub.f32 %v386_v32, %v3996_v40 }
  0x32   : > { %4645 = vst [vmem:[#allocation11_spill] sm:$0xff] %v4004_v43  ;;  %v515_v52 = vand.u32 4294901760, %v514_v41  ;;  %v524_v53 = vsub.f32 %v3984_v21, %v4558_v42  ;;  %v4553_v54 = vand.u32 4294901760, %v4004_v43  ;;  %v4020_v55 = vand.u32 4294901760, %v1550_v44 }
  0x33   : > { %4646 = vst [vmem:[#allocation12_spill] sm:$0xff] %v4013_v50  ;;  %v1679_v56 = vand.u32 4294901760, %v1678_v45  ;;  %v1688_v57 = vsub.f32 %v3991_v36, %v4556_v46  ;;  %v534_v59 = vsub.f32 %v3994_v39, %v4554_v47  ;;  %v4555_v60 = vand.u32 4294901760, %v4013_v50  ;;  %v341_v45 = vld [vmem:[%s3848_s12 + $0x40] sm:$0xff]  ;;  %v360_v46 = vld [vmem:[%s3856_s24 + $0x50] sm:$0xff]  ;;  %v348_v36 = vld [vmem:[%s3848_s12 + $0x78] sm:$0xff] }
  0x34   : > { %3112 = vmatmul.mubr.f32.gmra.mrb[2].mxu0 %v515_v52  ;;  %v525_v0 = vand.u32 4294901760, %v524_v53  ;;  %v1698_v1 = vsub.f32 %v4004_v43, %v4553_v54  ;;  %v4035_v2 = vsub.f32 %v1550_v44, %v4020_v55  ;;  %v389_v4 = vsel %vm366_vm0, %v357_v51, 0  ;;  %v359_v52 = vld [vmem:[%s3856_s24 + $0x48] sm:$0xff] }
  0x35   : > { %3268 = vmatmul.mubr.f32.gmra.mrb[2].mxu1 %v1679_v56  ;;  %v1689_v12 = vand.u32 4294901760, %v1688_v57  ;;  %v535_v13 = vand.u32 4294901760, %v534_v59  ;;  %v544_v32 = vsub.f32 %v4013_v50, %v4555_v60  ;;  %v4041_v41 = vand.u32 4294901760, %v389_v4  ;;  %v342_v53 = vld [vmem:[%s3848_s12 + $0x48] sm:$0xff] }
  0x36   : > { %4647 = vst [vmem:[#allocation13_spill] sm:$0xff] %v4035_v2  ;;  %3114 = vmatprep.mubr.f32.mxu0 %v525_v0  ;;  %v1699_v54 = vand.u32 4294901760, %v1698_v1  ;;  %v4557_v44 = vand.u32 4294901760, %v4035_v2  ;;  %v1553_v47 = vsel %vm366_vm0, %v340_v62, 0  ;;  %v392_v51 = vsel %vm366_vm0, %v358_v63, 0 }
  0x37   : > { %3270 = vmatprep.mubr.f32.mxu1 %v1689_v12  ;;  %v545_v56 = vand.u32 4294901760, %v544_v32  ;;  %v4050_v57 = vsub.f32 %v389_v4, %v4041_v41  ;;  %v4052_v59 = vand.u32 4294901760, %v1553_v47  ;;  %v4054_v60 = vand.u32 4294901760, %v392_v51 }
  0x38   : > { %3115 = vmatmul.mubr.f32.gmra.mrb[4].mxu0 %v535_v13  ;;  %v1708_v0 = vsub.f32 %v4035_v2, %v4557_v44  ;;  %v1556_v62 = vsel %vm366_vm0, %v341_v45, 0  ;;  %v395_v63 = vsel %vm366_vm0, %v359_v52, 0  ;;  %v1559_v1 = vsel %vm366_vm0, %v342_v53, 0  ;;  %v343_v44 = vld [vmem:[%s3848_s12 + $0x50] sm:$0xff] }
  0x39   : > { %4648 = vst [vmem:[#allocation14_spill] sm:$0xff] %v4050_v57  ;;  %3271 = vmatmul.mubr.f32.gmra.mrb[4].mxu1 %v1699_v54  ;;  %3117 = vmatprep.mubr.f32.mxu0 %v545_v56  ;;  %v4560_v4 = vand.u32 4294901760, %v4050_v57  ;;  %v4065_v12 = vsub.f32 %v1553_v47, %v4052_v59  ;;  %v4068_v32 = vsub.f32 %v392_v51, %v4054_v60  ;;  %v4070_v13 = vand.u32 4294901760, %v1556_v62 }
  0x3a   : > { %v1709_v42 = vand.u32 4294901760, %v1708_v0  ;;  %v4073_v45 = vand.u32 4294901760, %v395_v63  ;;  %v4075_v52 = vand.u32 4294901760, %v1559_v1  ;;  %v398_v54 = vsel %vm366_vm0, %v360_v46, 0 }
  0x3b   : > { %4649 = vst [vmem:[#allocation15_spill] sm:$0xff] %v4065_v12  ;;  %4650 = vst [vmem:[#allocation16_spill] sm:$0xff] %v4068_v32  ;;  %v554_v53 = vsub.f32 %v4050_v57, %v4560_v4  ;;  %v4566_v47 = vand.u32 4294901760, %v4065_v12  ;;  %v4568_v51 = vand.u32 4294901760, %v4068_v32  ;;  %v4084_v56 = vsub.f32 %v1556_v62, %v4070_v13 }
  0x3c   : > { %3273 = vmatprep.mubr.f32.mxu1 %v1709_v42  ;;  %v4087_v0 = vsub.f32 %v395_v63, %v4073_v45  ;;  %v4090_v35 = vsub.f32 %v1559_v1, %v4075_v52  ;;  %v4092_v46 = vand.u32 4294901760, %v398_v54  ;;  %v1562_v4 = vsel %vm366_vm0, %v343_v44, 0 }
  0x3d   : > { %4651 = vst [vmem:[#allocation17_spill] sm:$0xff] %v4084_v56  ;;  %v555_v49 = vand.u32 4294901760, %v554_v53  ;;  %v1718_v48 = vsub.f32 %v4065_v12, %v4566_v47  ;;  %v564_v42 = vsub.f32 %v4068_v32, %v4568_v51  ;;  %v4574_v62 = vand.u32 4294901760, %v4084_v56  ;;  %v344_v53 = vld [vmem:[%s3848_s12 + $0x58] sm:$0xff] }
  0x3e   : > { %4652 = vst [vmem:[#allocation18_spill] sm:$0xff] %v4087_v0  ;;  %4653 = vst [vmem:[#allocation19_spill] sm:$0xff] %v4090_v35  ;;  %v4575_v63 = vand.u32 4294901760, %v4087_v0  ;;  %v4106_v34 = vsub.f32 %v398_v54, %v4092_v46  ;;  %v4108_v44 = vand.u32 4294901760, %v1562_v4  ;;  %v401_v31 = vsel %vm366_vm0, %v361_v14, 0 }
  0x3f   : > { %3118 = vmatmul.mubr.f32.gmra.mrb[6].mxu0 %v555_v49  ;;  %v1719_v47 = vand.u32 4294901760, %v1718_v48  ;;  %v565_v27 = vand.u32 4294901760, %v564_v42  ;;  %v1728_v51 = vsub.f32 %v4084_v56, %v4574_v62  ;;  %v4655_v54 = vand.u32 4294901760, %v4090_v35  ;;  %v345_v48 = vld [vmem:[%s3848_s12 + $0x60] sm:$0xff] }
  0x40   : > { %4654 = vst [vmem:[#allocation20_spill] sm:$0xff] %v4106_v34  ;;  %v574_v1 = vsub.f32 %v4087_v0, %v4575_v63  ;;  %v4582_v12 = vand.u32 4294901760, %v4106_v34  ;;  %v4124_v49 = vsub.f32 %v1562_v4, %v4108_v44  ;;  %v4127_v14 = vand.u32 4294901760, %v401_v31  ;;  %v363_v0 = vld [vmem:[%s3856_s24 + $0x68] sm:$0xff] }
  0x41   : > { %v1738_v32 = vsub.f32 %v4090_v35, %v4655_v54  ;;  %3274 = vmatmul.mubr.f32.gmra.mrb[6].mxu1 %v1719_v47  ;;  %3120 = vmatprep.mubr.f32.mxu0 %v565_v27  ;;  %v1729_v42 = vand.u32 4294901760, %v1728_v51  ;;  %v1565_v62 = vsel %vm366_vm0, %v344_v53, 0  ;;  %v404_v63 = vsel %vm366_vm0, %v362_v33, 0  ;;  %v346_v53 = vld [vmem:[%s3848_s12 + $0x68] sm:$0xff] }
  0x42   : > { %4656 = vst [vmem:[#allocation21_spill] sm:$0xff] %v4124_v49  ;;  %4657 = vst [vmem:[#allocation22_spill] sm:$0xff] %v4127_v14  ;;  %v575_v56 = vand.u32 4294901760, %v574_v1  ;;  %v584_v4 = vsub.f32 %v4106_v34, %v4582_v12  ;;  %v4589_v35 = vand.u32 4294901760, %v4124_v49  ;;  %v4137_v27 = vsub.f32 %v401_v31, %v4127_v14  ;;  %v364_v1 = vld [vmem:[%s3856_s24 + $0x70] sm:$0xff] }
  0x43   : > { %v1739_v54 = vand.u32 4294901760, %v1738_v32  ;;  %3276 = vmatprep.mubr.f32.mxu1 %v1729_v42  ;;  %v4139_v47 = vand.u32 4294901760, %v1565_v62  ;;  %v4141_v51 = vand.u32 4294901760, %v404_v63  ;;  %v1568_v33 = vsel %vm366_vm0, %v345_v48, 0 }
  0x44   : > { %4658 = vst [vmem:[#allocation23_spill] sm:$0xff] %v4137_v27  ;;  %3121 = vmatmul.mubr.f32.gmra.mrb[8].mxu0 %v575_v56  ;;  %v585_v32 = vand.u32 4294901760, %v584_v4  ;;  %v1748_v12 = vsub.f32 %v4124_v49, %v4589_v35  ;;  %v4149_v34 = vand.u32 4294901760, %v1568_v33  ;;  %v407_v31 = vsel %vm366_vm0, %v363_v0, 0  ;;  %v347_v56 = vld [vmem:[%s3848_s12 + $0x70] sm:$0xff]  ;;  %s2748_s12 = sshll.u32 %s4453_s9, 4  ;;  %s4477_s12 = int_to_ptr.vmem [resolvable:$true] %s2748_s12 }
  0x45   : > { %4659 = vst [vmem:[#allocation24_spill] sm:$0xff] %v4139_v47  ;;  %4660 = vst [vmem:[#allocation25_spill] sm:$0xff] %v4141_v51  ;;  %3277 = vmatmul.mubr.f32.gmra.mrb[8].mxu1 %v1739_v54  ;;  %v4596_v42 = vand.u32 4294901760, %v4137_v27  ;;  %v4154_v57 = vsub.f32 %v1565_v62, %v4139_v47  ;;  %v4157_v48 = vsub.f32 %v404_v63, %v4141_v51  ;;  %v4159_v2 = vand.u32 4294901760, %v407_v31 }
  0x46   : > { %4661 = vst [vmem:[#allocation26_spill] sm:$0xff] %v4149_v34  ;;  %3123 = vmatprep.mubr.f32.mxu0 %v585_v32  ;;  %v1749_v4 = vand.u32 4294901760, %v1748_v12  ;;  %v4163_v35 = vsub.f32 %v1568_v33, %v4149_v34  ;;  %v1571_v0 = vsel %vm366_vm0, %v346_v53, 0  ;;  %v410_v54 = vsel %vm366_vm0, %v364_v1, 0  ;;  %v365_v32 = vld [vmem:[%s3856_s24 + $0x78] sm:$0xff]  ;;  %s2718_s24 = scalar_lea.sflag [#allocation3], %s4446_s7 }
  0x47   : > { %4662 = vst [vmem:[#allocation27_spill] sm:$0xff] %v4154_v57  ;;  %4663 = vst [vmem:[#allocation28_spill] sm:$0xff] %v4157_v48  ;;  %v594_v62 = vsub.f32 %v4137_v27, %v4596_v42  ;;  %v4603_v63 = vand.u32 4294901760, %v4154_v57  ;;  %v4606_v49 = vand.u32 4294901760, %v4157_v48  ;;  %v4173_v50 = vsub.f32 %v407_v31, %v4159_v2 }
  0x48   : > { %4664 = vst [vmem:[#allocation29_spill] sm:$0xff] %v4159_v2  ;;  %4665 = vst [vmem:[#allocation30_spill] sm:$0xff] %v4163_v35  ;;  %3279 = vmatprep.mubr.f32.mxu1 %v1749_v4  ;;  %v4611_v12 = vand.u32 4294901760, %v4163_v35  ;;  %v4176_v33 = vand.u32 4294901760, %v1571_v0  ;;  %v4178_v53 = vand.u32 4294901760, %v410_v54  ;;  %v1574_v1 = vsel %vm366_vm0, %v347_v56, 0 }
  0x49   : > { %v595_v43 = vand.u32 4294901760, %v594_v62  ;;  %v1758_v42 = vsub.f32 %v4154_v57, %v4603_v63  ;;  %v604_v31 = vsub.f32 %v4157_v48, %v4606_v49  ;;  %v4616_v4 = vand.u32 4294901760, %v4173_v50 }
  0x4a   : > { %4666 = vst [vmem:[#allocation31_spill] sm:$0xff] %v4176_v33  ;;  %4667 = vst [vmem:[#allocation32_spill] sm:$0xff] %v4178_v53  ;;  %v1768_v27 = vsub.f32 %v4163_v35, %v4611_v12  ;;  %v4193_v39 = vsub.f32 %v1571_v0, %v4176_v33  ;;  %v4196_v56 = vsub.f32 %v410_v54, %v4178_v53  ;;  %v4198_v62 = vand.u32 4294901760, %v1574_v1 }
  0x4b   : > { %3124 = vmatmul.mubr.f32.gmra.mrb[10].mxu0 %v595_v43  ;;  %v1759_v63 = vand.u32 4294901760, %v1758_v42  ;;  %v605_v57 = vand.u32 4294901760, %v604_v31  ;;  %v614_v49 = vsub.f32 %v4173_v50, %v4616_v4  ;;  %v413_v48 = vsel %vm366_vm0, %v365_v32, 0 }
  0x4c   : > { %4668 = vst [vmem:[#allocation33_spill] sm:$0xff] %v4198_v62  ;;  %v1769_v21 = vand.u32 4294901760, %v1768_v27  ;;  %v4614_v12 = vand.u32 4294901760, %v4193_v39  ;;  %v4615_v0 = vand.u32 4294901760, %v4196_v56  ;;  %v4208_v54 = vsub.f32 %v1574_v1, %v4198_v62 }
  0x4d   : > { %3280 = vmatmul.mubr.f32.gmra.mrb[10].mxu1 %v1759_v63  ;;  %3126 = vmatprep.mubr.f32.mxu0 %v605_v57  ;;  %v615_v35 = vand.u32 4294901760, %v614_v49  ;;  %v4210_v43 = vand.u32 4294901760, %v413_v48  ;;  %v1577_v42 = vsel %vm366_vm0, %v348_v36, 0 }
  0x4e   : > { %3282 = vmatprep.mubr.f32.mxu1 %v1769_v21  ;;  %v1778_v32 = vsub.f32 %v4193_v39, %v4614_v12  ;;  %v624_v27 = vsub.f32 %v4196_v56, %v4615_v0  ;;  %v4619_v31 = vand.u32 4294901760, %v4208_v54  ;;  %v4220_v1 = vand.u32 4294901760, %v1577_v42 }
  0x4f   : > { %4669 = vst [vmem:[#allocation34_spill] sm:$0xff] %v4210_v43  ;;  %3127 = vmatmul.mubr.f32.gmra.mrb[12].mxu0 %v615_v35  ;;  %v4223_v57 = vsub.f32 %v413_v48, %v4210_v43 }
  0x50   : > { %4670 = vst [vmem:[#allocation35_spill] sm:$0xff] %v4220_v1  ;;  %v1779_v49 = vand.u32 4294901760, %v1778_v32  ;;  %v625_v63 = vand.u32 4294901760, %v624_v27  ;;  %v1788_v21 = vsub.f32 %v4208_v54, %v4619_v31  ;;  %v4229_v36 = vsub.f32 %v1577_v42, %v4220_v1  ;;  %v4674_v42 = vld [vmem:[#allocation11_spill] sm:$0xff]  ;;  %v4684_v31 = vld [vmem:[#allocation21_spill] sm:$0xff] }
  0x51   : > { %v4618_v12 = vand.u32 4294901760, %v4223_v57 }
  0x52   : > { %3283 = vmatmul.mubr.f32.gmra.mrb[12].mxu1 %v1779_v49  ;;  %3129 = vmatprep.mubr.f32.mxu0 %v625_v63  ;;  %v1789_v0 = vand.u32 4294901760, %v1788_v21  ;;  %v4617_v4 = vand.u32 4294901760, %v4229_v36  ;;  %v4675_v49 = vld [vmem:[#allocation12_spill] sm:$0xff]  ;;  %v4676_v63 = vld [vmem:[#allocation13_spill] sm:$0xff]  ;;  %v4677_v21 = vld [vmem:[#allocation14_spill] sm:$0xff] }
  0x53   : > { %v634_v35 = vsub.f32 %v4223_v57, %v4618_v12  ;;  %v4683_v12 = vld [vmem:[#allocation20_spill] sm:$0xff] }
  0x54   : > { %3285 = vmatprep.mubr.f32.mxu1 %v1789_v0  ;;  %v1798_v48 = vsub.f32 %v4229_v36, %v4617_v4  ;;  %v4673_v0 = vld [vmem:[#allocation10_spill] sm:$0xff]  ;;  %v4682_v4 = vld [vmem:[#allocation19_spill] sm:$0xff] }
  0x55   : > { %v635_v32 = vand.u32 4294901760, %v634_v35  ;;  %v4678_v35 = vld [vmem:[#allocation15_spill] sm:$0xff] }
  0x56   : > { %v1799_v27 = vand.u32 4294901760, %v1798_v48  ;;  %v4679_v48 = vld [vmem:[#allocation16_spill] sm:$0xff] }
  0x57   : > { %3130 = vmatmul.mubr.f32.gmra.mrb[14].mxu0 %v635_v32  ;;  %v4680_v32 = vld [vmem:[#allocation17_spill] sm:$0xff] }
  0x58   : > { %3286 = vmatmul.mubr.f32.gmra.mrb[14].mxu1 %v1799_v27  ;;  %3134 = vmatprep.mubr.f32.mxu0 %v3878_v15  ;;  %v4681_v27 = vld [vmem:[#allocation18_spill] sm:$0xff] }
  0x59   : > { %3290 = vmatprep.mubr.f32.mxu1 %v3872_v11 }
  0x5b   : > { %3135 = vmatmul.mubr.f32.vlgmr.msra.gmra.mrb[0].mxu0 %v3883_v17 }
  0x5c   : > { %3159 = vmatpush3.msra.mxu0 %v3881_v16  ;;  %3291 = vmatmul.mubr.f32.vlgmr.msra.gmra.mrb[0].mxu1 %v3885_v18  ;;  %v4671_v16 = vld [vmem:[#allocation8_spill] sm:$0xff] }
  0x5d   : > { %3315 = vmatpush3.msra.mxu1 %v3893_v20  ;;  %3137 = vmatprep.mubr.f32.mxu0 %v3914_v29  ;;  %v4672_v20 = vld [vmem:[#allocation9_spill] sm:$0xff] }
  0x5e   : > { %3293 = vmatprep.mubr.f32.mxu1 %v3916_v30  ;;  %3184 = vmatprep.subr.mxu0 %v3863_v3 }
  0x5f   : > { %3138 = vmatmul.mubr.f32.gmra.mrb[2].mxu0 %v3957_v58  ;;  %3340 = vmatprep.subr.mxu1 %v3869_v9 }
  0x60   : > { %3294 = vmatmul.mubr.f32.gmra.mrb[2].mxu1 %v3961_v61  ;;  %3140 = vmatprep.mubr.f32.mxu0 %v3970_v6 }
  0x61   : > { %3296 = vmatprep.mubr.f32.mxu1 %v3975_v8 }
  0x63   : > { %3141 = vmatmul.mubr.f32.gmra.mrb[4].mxu0 %v3977_v10 }
  0x64   : > { %3297 = vmatmul.mubr.f32.gmra.mrb[4].mxu1 %v3986_v22  ;;  %3143 = vmatprep.mubr.f32.mxu0 %v3996_v40 }
  0x65   : > { %3299 = vmatprep.mubr.f32.mxu1 %v4020_v55 }
  0x67   : > { %3144 = vmatmul.mubr.f32.gmra.mrb[6].mxu0 %v4041_v41 }
  0x68   : > { %3300 = vmatmul.mubr.f32.gmra.mrb[6].mxu1 %v4052_v59  ;;  %3146 = vmatprep.mubr.f32.mxu0 %v4054_v60 }
  0x69   : > { %3302 = vmatprep.mubr.f32.mxu1 %v4070_v13 }
  0x6b   : > { %3147 = vmatmul.mubr.f32.gmra.mrb[8].mxu0 %v4073_v45 }
  0x6c   : > { %3303 = vmatmul.mubr.f32.gmra.mrb[8].mxu1 %v4075_v52  ;;  %3149 = vmatprep.mubr.f32.mxu0 %v4092_v46 }
  0x6d   : > { %3305 = vmatprep.mubr.f32.mxu1 %v4108_v44 }
  0x6f   : > { %3150 = vmatmul.mubr.f32.gmra.mrb[10].mxu0 %v4127_v14  ;;  %v4694_v14 = vand.u32 4294901760, %v3932_v38 }
  0x70   : > { %3306 = vmatmul.mubr.f32.gmra.mrb[10].mxu1 %v4139_v47  ;;  %3152 = vmatprep.mubr.f32.mxu0 %v4141_v51  ;;  %v4692_v51 = vand.u32 4294901760, %v3908_v26  ;;  %v4693_v47 = vand.u32 4294901760, %v3929_v37 }
  0x71   : > { %3308 = vmatprep.mubr.f32.mxu1 %v4149_v34  ;;  %v4691_v34 = vand.u32 4294901760, %v3905_v25 }
  0x73   : > { %3153 = vmatmul.mubr.f32.gmra.mrb[12].mxu0 %v4159_v2  ;;  %v4690_v2 = vand.u32 4294901760, %v3890_v19 }
  0x74   : > { %3309 = vmatmul.mubr.f32.gmra.mrb[12].mxu1 %v4176_v33  ;;  %3155 = vmatprep.mubr.f32.mxu0 %v4178_v53  ;;  %v4688_v53 = vld [vmem:[#allocation30_spill] sm:$0xff]  ;;  %v4689_v33 = vand.u32 4294901760, %v3899_v23 }
  0x75   : > { %3311 = vmatprep.mubr.f32.mxu1 %v4198_v62  ;;  %v4687_v62 = vld [vmem:[#allocation28_spill] sm:$0xff] }
  0x77   : > { %3156 = vmatmul.mubr.f32.gmra.mrb[14].mxu0 %v4210_v43  ;;  %v4686_v43 = vld [vmem:[#allocation27_spill] sm:$0xff] }
  0x78   : > { %3312 = vmatmul.mubr.f32.gmra.mrb[14].mxu1 %v4220_v1  ;;  %3160 = vmatprep.mubr.f32.mxu0 %v3899_v23  ;;  %v4685_v1 = vld [vmem:[#allocation23_spill] sm:$0xff]  ;;  %v4696_v23 = vand.u32 4294901760, %v3973_v7 }
  0x79   : > { %3316 = vmatprep.mubr.f32.mxu1 %v3890_v19  ;;  %v4695_v19 = vand.u32 4294901760, %v3968_v5 }
  0x7b   : > { %3161 = vmatmul.mubr.f32.vlgmr.msra.gmra.mrb[0].mxu0 %v3905_v25  ;;  %v4698_v25 = vand.u32 4294901760, %v4672_v20 }
  0x7c   : > { %3185 = vmatpush3.msra.mxu0 %v3863_v3  ;;  %3317 = vmatmul.mubr.f32.vlgmr.msra.gmra.mrb[0].mxu1 %v3908_v26  ;;  %v4699_v26 = vand.u32 4294901760, %v4673_v0 }
  0x7d   : > { %3341 = vmatpush3.msra.mxu1 %v3869_v9  ;;  %3163 = vmatprep.mubr.f32.mxu0 %v3929_v37  ;;  %v4702_v37 = vand.u32 4294901760, %v4676_v63 }
  0x7e   : > { %3319 = vmatprep.mubr.f32.mxu1 %v3932_v38  ;;  %3210 = vmatprep.subr.mxu0 %v3902_v24  ;;  %v4703_v38 = vand.u32 4294901760, %v4677_v21 }
  0x7f   : > { %3164 = vmatmul.mubr.f32.gmra.mrb[2].mxu0 %v3968_v5  ;;  %3366 = vmatprep.subr.mxu1 %v3912_v28  ;;  %v4704_v5 = vand.u32 4294901760, %v4678_v35 }
  0x80   : > { %3320 = vmatmul.mubr.f32.gmra.mrb[2].mxu1 %v3973_v7  ;;  %3166 = vmatprep.mubr.f32.mxu0 %v4671_v16  ;;  %v4705_v7 = vand.u32 4294901760, %v4679_v48 }
  0x81   : > { %3322 = vmatprep.mubr.f32.mxu1 %v4672_v20  ;;  %v4712_v20 = vand.u32 4294901760, %v4686_v43 }
  0x83   : > { %3167 = vmatmul.mubr.f32.gmra.mrb[4].mxu0 %v4673_v0  ;;  %v4713_v0 = vand.u32 4294901760, %v4687_v62 }
  0x84   : > { %3323 = vmatmul.mubr.f32.gmra.mrb[4].mxu1 %v4674_v42  ;;  %3169 = vmatprep.mubr.f32.mxu0 %v4675_v49 }
  0x85   : > { %3325 = vmatprep.mubr.f32.mxu1 %v4676_v63 }
  0x87   : > { %3170 = vmatmul.mubr.f32.gmra.mrb[6].mxu0 %v4677_v21 }
  0x88   : > { %3326 = vmatmul.mubr.f32.gmra.mrb[6].mxu1 %v4678_v35  ;;  %3172 = vmatprep.mubr.f32.mxu0 %v4679_v48 }
  0x89   : > { %3328 = vmatprep.mubr.f32.mxu1 %v4680_v32 }
  0x8b   : > { %3173 = vmatmul.mubr.f32.gmra.mrb[8].mxu0 %v4681_v27 }
  0x8c   : > { %3329 = vmatmul.mubr.f32.gmra.mrb[8].mxu1 %v4682_v4  ;;  %3175 = vmatprep.mubr.f32.mxu0 %v4683_v12 }
  0x8d   : > { %3331 = vmatprep.mubr.f32.mxu1 %v4684_v31 }
  0x8f   : > { %3176 = vmatmul.mubr.f32.gmra.mrb[10].mxu0 %v4685_v1 }
  0x90   : > { %3332 = vmatmul.mubr.f32.gmra.mrb[10].mxu1 %v4686_v43  ;;  %3178 = vmatprep.mubr.f32.mxu0 %v4687_v62  ;;  %v4719_v43 = vand.u32 4294901760, %v4223_v57  ;;  %v4720_v62 = vand.u32 4294901760, %v4229_v36 }
  0x91   : > { %3334 = vmatprep.mubr.f32.mxu1 %v4688_v53 }
  0x93   : > { %3179 = vmatmul.mubr.f32.gmra.mrb[12].mxu0 %v4173_v50 }
  0x94   : > { %3335 = vmatmul.mubr.f32.gmra.mrb[12].mxu1 %v4193_v39  ;;  %3181 = vmatprep.mubr.f32.mxu0 %v4196_v56 }
  0x95   : > { %3337 = vmatprep.mubr.f32.mxu1 %v4208_v54 }
  0x97   : > { %3182 = vmatmul.mubr.f32.gmra.mrb[14].mxu0 %v4223_v57  ;;  %v4728_v57 = vld [vmem:[#allocation33_spill] sm:$0xff] }
  0x98   : > { %3338 = vmatmul.mubr.f32.gmra.mrb[14].mxu1 %v4229_v36  ;;  %3186 = vmatprep.mubr.f32.mxu0 %v4689_v33  ;;  %v4710_v33 = vand.u32 4294901760, %v4684_v31  ;;  %v4717_v31 = vand.u32 4294901760, %v4196_v56  ;;  %v4726_v56 = vld [vmem:[#allocation31_spill] sm:$0xff]  ;;  %v4729_v36 = vld [vmem:[#allocation34_spill] sm:$0xff] }
  0x99   : > { %3342 = vmatprep.mubr.f32.mxu1 %v4690_v2  ;;  %v4706_v2 = vand.u32 4294901760, %v4680_v32 }
  0x9b   : > { %3187 = vmatmul.mubr.f32.vlgmr.msra.gmra.mrb[0].mxu0 %v4691_v34  ;;  %v4701_v34 = vand.u32 4294901760, %v4675_v49  ;;  %v4730_v49 = vld [vmem:[#allocation35_spill] sm:$0xff] }
  0x9c   : > { %3211 = vmatpush3.msra.mxu0 %v3902_v24  ;;  %3343 = vmatmul.mubr.f32.vlgmr.msra.gmra.mrb[0].mxu1 %v4692_v51  ;;  %v4697_v24 = vand.u32 4294901760, %v4671_v16  ;;  %v4709_v51 = vand.u32 4294901760, %v4683_v12  ;;  %v4711_v16 = vand.u32 4294901760, %v4685_v1  ;;  %v4716_v12 = vand.u32 4294901760, %v4193_v39  ;;  %v4723_v39 = vld [vmem:[#allocation25_spill] sm:$0xff] }
  0x9d   : > { %3367 = vmatpush3.msra.mxu1 %v3912_v28  ;;  %3189 = vmatprep.mubr.f32.mxu0 %v4693_v47  ;;  %v4700_v28 = vand.u32 4294901760, %v4674_v42  ;;  %v4708_v47 = vand.u32 4294901760, %v4682_v4  ;;  %v4714_v42 = vand.u32 4294901760, %v4688_v53  ;;  %v4715_v4 = vand.u32 4294901760, %v4173_v50  ;;  %v4724_v50 = vld [vmem:[#allocation26_spill] sm:$0xff]  ;;  %v4725_v53 = vld [vmem:[#allocation29_spill] sm:$0xff] }
  0x9e   : > { %3345 = vmatprep.mubr.f32.mxu1 %v4694_v14  ;;  %3236 = vmatprep.subr.mxu0 %v3863_v3  ;;  %v4707_v14 = vand.u32 4294901760, %v4681_v27  ;;  %v4718_v1 = vand.u32 4294901760, %v4208_v54  ;;  %v4727_v54 = vld [vmem:[#allocation32_spill] sm:$0xff] }
  0x9f   : > { %3190 = vmatmul.mubr.f32.gmra.mrb[2].mxu0 %v4695_v19  ;;  %3392 = vmatprep.subr.mxu1 %v3869_v9 }
  0xa0   : > { %3346 = vmatmul.mubr.f32.gmra.mrb[2].mxu1 %v4696_v23  ;;  %3192 = vmatprep.mubr.f32.mxu0 %v4697_v24 }
  0xa1   : > { %3348 = vmatprep.mubr.f32.mxu1 %v4698_v25 }
  0xa3   : > { %3193 = vmatmul.mubr.f32.gmra.mrb[4].mxu0 %v4699_v26 }
  0xa4   : > { %3349 = vmatmul.mubr.f32.gmra.mrb[4].mxu1 %v4700_v28  ;;  %3195 = vmatprep.mubr.f32.mxu0 %v4701_v34 }
  0xa5   : > { %3351 = vmatprep.mubr.f32.mxu1 %v4702_v37 }
  0xa7   : > { %3196 = vmatmul.mubr.f32.gmra.mrb[6].mxu0 %v4703_v38 }
  0xa8   : > { %3352 = vmatmul.mubr.f32.gmra.mrb[6].mxu1 %v4704_v5  ;;  %3198 = vmatprep.mubr.f32.mxu0 %v4705_v7 }
  0xa9   : > { %3354 = vmatprep.mubr.f32.mxu1 %v4706_v2 }
  0xab   : > { %3199 = vmatmul.mubr.f32.gmra.mrb[8].mxu0 %v4707_v14 }
  0xac   : > { %3355 = vmatmul.mubr.f32.gmra.mrb[8].mxu1 %v4708_v47  ;;  %3201 = vmatprep.mubr.f32.mxu0 %v4709_v51 }
  0xad   : > { %3357 = vmatprep.mubr.f32.mxu1 %v4710_v33 }
  0xaf   : > { %3202 = vmatmul.mubr.f32.gmra.mrb[10].mxu0 %v4711_v16 }
  0xb0   : > { %3358 = vmatmul.mubr.f32.gmra.mrb[10].mxu1 %v4712_v20  ;;  %3204 = vmatprep.mubr.f32.mxu0 %v4713_v0 }
  0xb1   : > { %3360 = vmatprep.mubr.f32.mxu1 %v4714_v42 }
  0xb3   : > { %3205 = vmatmul.mubr.f32.gmra.mrb[12].mxu0 %v4715_v4 }
  0xb4   : > { %3361 = vmatmul.mubr.f32.gmra.mrb[12].mxu1 %v4716_v12  ;;  %3207 = vmatprep.mubr.f32.mxu0 %v4717_v31 }
  0xb5   : > { %3363 = vmatprep.mubr.f32.mxu1 %v4718_v1 }
  0xb7   : > { %3208 = vmatmul.mubr.f32.gmra.mrb[14].mxu0 %v4719_v43 }
  0xb8   : > { %3364 = vmatmul.mubr.f32.gmra.mrb[14].mxu1 %v4720_v62  ;;  %3212 = vmatprep.mubr.f32.mxu0 %v3878_v15 }
  0xb9   : > { %3368 = vmatprep.mubr.f32.mxu1 %v3872_v11 }
  0xbb   : > { %3213 = vmatmul.mubr.f32.vlgmr.msra.gmra.mrb[0].mxu0 %v3883_v17 }
  0xbc   : > { %3237 = vmatpush3.msra.mxu0 %v3863_v3  ;;  %3369 = vmatmul.mubr.f32.vlgmr.msra.gmra.mrb[0].mxu1 %v3885_v18  ;;  %v4721_v3 = vld [vmem:[#allocation22_spill] sm:$0xff] }
  0xbd   : > { %3393 = vmatpush3.msra.mxu1 %v3869_v9  ;;  %3215 = vmatprep.mubr.f32.mxu0 %v3914_v29  ;;  %v4722_v9 = vld [vmem:[#allocation24_spill] sm:$0xff] }
  0xbe   : > { %3371 = vmatprep.mubr.f32.mxu1 %v3916_v30 }
  0xbf   : > { %3216 = vmatmul.mubr.f32.gmra.mrb[2].mxu0 %v3957_v58 }
  0xc0   : > { %3372 = vmatmul.mubr.f32.gmra.mrb[2].mxu1 %v3961_v61  ;;  %3218 = vmatprep.mubr.f32.mxu0 %v3970_v6 }
  0xc1   : > { %3374 = vmatprep.mubr.f32.mxu1 %v3975_v8 }
  0xc3   : > { %3219 = vmatmul.mubr.f32.gmra.mrb[4].mxu0 %v3977_v10 }
  0xc4   : > { %3375 = vmatmul.mubr.f32.gmra.mrb[4].mxu1 %v3986_v22  ;;  %3221 = vmatprep.mubr.f32.mxu0 %v3996_v40 }
  0xc5   : > { %3377 = vmatprep.mubr.f32.mxu1 %v4020_v55 }
  0xc7   : > { %3222 = vmatmul.mubr.f32.gmra.mrb[6].mxu0 %v4041_v41 }
  0xc8   : > { %3378 = vmatmul.mubr.f32.gmra.mrb[6].mxu1 %v4052_v59  ;;  %3224 = vmatprep.mubr.f32.mxu0 %v4054_v60 }
  0xc9   : > { %3380 = vmatprep.mubr.f32.mxu1 %v4070_v13 }
  0xcb   : > { %3225 = vmatmul.mubr.f32.gmra.mrb[8].mxu0 %v4073_v45 }
  0xcc   : > { %3381 = vmatmul.mubr.f32.gmra.mrb[8].mxu1 %v4075_v52  ;;  %3227 = vmatprep.mubr.f32.mxu0 %v4092_v46 }
  0xcd   : > { %3383 = vmatprep.mubr.f32.mxu1 %v4108_v44 }
  0xcf   : > { %3228 = vmatmul.mubr.f32.gmra.mrb[10].mxu0 %v4721_v3 }
  0xd0   : > { %3384 = vmatmul.mubr.f32.gmra.mrb[10].mxu1 %v4722_v9  ;;  %3230 = vmatprep.mubr.f32.mxu0 %v4723_v39 }
  0xd1   : > { %3386 = vmatprep.mubr.f32.mxu1 %v4724_v50 }
  0xd3   : > { %3231 = vmatmul.mubr.f32.gmra.mrb[12].mxu0 %v4725_v53 }
  0xd4   : > { %3387 = vmatmul.mubr.f32.gmra.mrb[12].mxu1 %v4726_v56  ;;  %3233 = vmatprep.mubr.f32.mxu0 %v4727_v54 }
  0xd5   : > { %3389 = vmatprep.mubr.f32.mxu1 %v4728_v57 }
  0xd7   : > { %3234 = vmatmul.mubr.f32.gmra.mrb[14].mxu0 %v4729_v36 }
  0xd8   : > { %3390 = vmatmul.mubr.f32.gmra.mrb[14].mxu1 %v4730_v49  ;;  %3238 = vmatprep.mubr.f32.mxu0 %v3878_v15 }
  0xd9   : > { %3394 = vmatprep.mubr.f32.mxu1 %v3872_v11  ;;  %v3755_v11 = vmov 1e+30  }
  0xda   : > { %332 = vst [vmem:[%s4449_s8] sm:$0x1] %v3755_v11  ;;  %331 = vst [vmem:[%s4453_s9] sm:$0x1] %v3755_v11 }
  0xdb   : > { %3239 = vmatmul.mubr.f32.vlgmr.msra.gmra.mrb[0].mxu0 %v3883_v17 }
  0xdc   : > { %3395 = vmatmul.mubr.f32.vlgmr.msra.gmra.mrb[0].mxu1 %v3885_v18  ;;  %3241 = vmatprep.mubr.f32.mxu0 %v3914_v29 }
  0xdd   : > { %3397 = vmatprep.mubr.f32.mxu1 %v3916_v30 }
  0xdf   : > { %3242 = vmatmul.mubr.f32.gmra.mrb[2].mxu0 %v3957_v58 }
  0xe0   : > { %3398 = vmatmul.mubr.f32.gmra.mrb[2].mxu1 %v3961_v61  ;;  %3244 = vmatprep.mubr.f32.mxu0 %v3970_v6 }
  0xe1   : > { %3400 = vmatprep.mubr.f32.mxu1 %v3975_v8 }
  0xe3   : > { %3245 = vmatmul.mubr.f32.gmra.mrb[4].mxu0 %v3977_v10 }
  0xe4   : > { %3401 = vmatmul.mubr.f32.gmra.mrb[4].mxu1 %v3986_v22  ;;  %3247 = vmatprep.mubr.f32.mxu0 %v3996_v40 }
  0xe5   : > { %3403 = vmatprep.mubr.f32.mxu1 %v4020_v55 }
  0xe7   : > { %3248 = vmatmul.mubr.f32.gmra.mrb[6].mxu0 %v4041_v41 }
  0xe8   : > { %3404 = vmatmul.mubr.f32.gmra.mrb[6].mxu1 %v4052_v59  ;;  %3250 = vmatprep.mubr.f32.mxu0 %v4054_v60 }
  0xe9   : > { %3406 = vmatprep.mubr.f32.mxu1 %v4070_v13 }
  0xeb   : > { %3251 = vmatmul.mubr.f32.gmra.mrb[8].mxu0 %v4073_v45 }
  0xec   : > { %3407 = vmatmul.mubr.f32.gmra.mrb[8].mxu1 %v4075_v52  ;;  %3253 = vmatprep.mubr.f32.mxu0 %v4092_v46 }
  0xed   : > { %3409 = vmatprep.mubr.f32.mxu1 %v4108_v44 }
  0xef   : > { %3254 = vmatmul.mubr.f32.gmra.mrb[10].mxu0 %v4721_v3 }
  0xf0   : > { %3410 = vmatmul.mubr.f32.gmra.mrb[10].mxu1 %v4722_v9  ;;  %3256 = vmatprep.mubr.f32.mxu0 %v4723_v39 }
  0xf1   : > { %3412 = vmatprep.mubr.f32.mxu1 %v4724_v50 }
  0xf3   : > { %3257 = vmatmul.mubr.f32.gmra.mrb[12].mxu0 %v4725_v53 }
  0xf4   : > { %3413 = vmatmul.mubr.f32.gmra.mrb[12].mxu1 %v4726_v56  ;;  %3259 = vmatprep.mubr.f32.mxu0 %v4727_v54 }
  0xf5   : > { %3415 = vmatprep.mubr.f32.mxu1 %v4728_v57 }
  0xf7   : > { %3260 = vmatmul.mubr.f32.gmra.mrb[14].mxu0 %v4729_v36 }
  0xf8   : > { %3416 = vmatmul.mubr.f32.gmra.mrb[14].mxu1 %v4730_v49 }
 0x1ae   : > { %v3240_v15 = vpop.f32.mrb[0].mxu0 }
 0x1af   : > { %v3396_v17 = vpop.f32.mrb[0].mxu1  ;;  %v1412_v18 = vpop.f32.mrb[1].mxu0 }
 0x1b0   : > { %v2576_v29 = vpop.f32.mrb[1].mxu1 }
 0x1b2   : > { %v3243_v30 = vpop.f32.mrb[2].mxu0 }
 0x1b3   : > { %v3399_v58 = vpop.f32.mrb[2].mxu1  ;;  %v1424_v61 = vpop.f32.mrb[3].mxu0 }
 0x1b4   : > { %v2588_v6 = vpop.f32.mrb[3].mxu1 }
 0x1b6   : > { %v3246_v8 = vpop.f32.mrb[4].mxu0 }
 0x1b7   : > { %v1508_v10 = vmin.f32 %v3240_v15, %v3246_v8  ;;  %v3402_v22 = vpop.f32.mrb[4].mxu1  ;;  %v1436_v40 = vpop.f32.mrb[5].mxu0  ;;  %v1506_v8 = vld [vmem:[%s4449_s8] sm:$0x1] }
 0x1b8   : > { %v2672_v55 = vmin.f32 %v3396_v17, %v3402_v22  ;;  %v1507_v60 = vmin.f32 %v1412_v18, %v1436_v40  ;;  %v2600_v41 = vpop.f32.mrb[5].mxu1  ;;  %v2670_v22 = vld [vmem:[%s4453_s9] sm:$0x1] }
 0x1b9   : > { %v2671_v59 = vmin.f32 %v2576_v29, %v2600_v41 }
 0x1ba   : > { %v3249_v13 = vpop.f32.mrb[6].mxu0 }
 0x1bb   : > { %v1510_v45 = vmin.f32 %v3243_v30, %v3249_v13  ;;  %v3405_v52 = vpop.f32.mrb[6].mxu1  ;;  %v1448_v46 = vpop.f32.mrb[7].mxu0 }
 0x1bc   : > { %v2674_v44 = vmin.f32 %v3399_v58, %v3405_v52  ;;  %v1509_v63 = vmin.f32 %v1424_v61, %v1448_v46  ;;  %v2612_v21 = vpop.f32.mrb[7].mxu1 }
 0x1bd   : > { %v2673_v35 = vmin.f32 %v2588_v6, %v2612_v21 }
 0x1be   : > { %v3252_v48 = vpop.f32.mrb[8].mxu0 }
 0x1bf   : > { %v1512_v32 = vmin.f32 %v1508_v10, %v3252_v48  ;;  %v3408_v27 = vpop.f32.mrb[8].mxu1  ;;  %v1460_v19 = vpop.f32.mrb[9].mxu0 }
 0x1c0   : > { %v2676_v23 = vmin.f32 %v2672_v55, %v3408_v27  ;;  %v1511_v24 = vmin.f32 %v1507_v60, %v1460_v19  ;;  %v2624_v25 = vpop.f32.mrb[9].mxu1 }
 0x1c1   : > { %v2675_v26 = vmin.f32 %v2671_v59, %v2624_v25 }
 0x1c2   : > { %v3255_v28 = vpop.f32.mrb[10].mxu0 }
 0x1c3   : > { %v1514_v34 = vmin.f32 %v1510_v45, %v3255_v28  ;;  %v3411_v37 = vpop.f32.mrb[10].mxu1  ;;  %v1472_v38 = vpop.f32.mrb[11].mxu0 }
 0x1c4   : > { %v2678_v5 = vmin.f32 %v2674_v44, %v3411_v37  ;;  %v1513_v7 = vmin.f32 %v1509_v63, %v1472_v38  ;;  %v2636_v2 = vpop.f32.mrb[11].mxu1 }
 0x1c5   : > { %v2677_v14 = vmin.f32 %v2673_v35, %v2636_v2 }
 0x1c6   : > { %v3258_v47 = vpop.f32.mrb[12].mxu0 }
 0x1c7   : > { %v1516_v51 = vmin.f32 %v1512_v32, %v3258_v47  ;;  %v3414_v33 = vpop.f32.mrb[12].mxu1  ;;  %v1484_v16 = vpop.f32.mrb[13].mxu0 }
 0x1c8   : > { %v2680_v20 = vmin.f32 %v2676_v23, %v3414_v33  ;;  %v1515_v0 = vmin.f32 %v1511_v24, %v1484_v16  ;;  %v2648_v42 = vpop.f32.mrb[13].mxu1 }
 0x1c9   : > { %v2679_v4 = vmin.f32 %v2675_v26, %v2648_v42 }
 0x1ca   : > { %v1519_v12 = vmin.f32 %v1515_v0, %v1516_v51  ;;  %v3261_v31 = vpop.f32.mrb[14].mxu0 }
 0x1cb   : > { %v2683_v1 = vmin.f32 %v2679_v4, %v2680_v20  ;;  %v1518_v43 = vmin.f32 %v1514_v34, %v3261_v31  ;;  %v3417_v62 = vpop.f32.mrb[14].mxu1  ;;  %v1496_v3 = vpop.f32.mrb[15].mxu0 }
 0x1cc   : > { %v2682_v9 = vmin.f32 %v2678_v5, %v3417_v62  ;;  %v1517_v39 = vmin.f32 %v1513_v7, %v1496_v3  ;;  %v2660_v50 = vpop.f32.mrb[15].mxu1 }
 0x1cd   : > { %v2681_v53 = vmin.f32 %v2677_v14, %v2660_v50 }
 0x1ce   : > { %v1520_v56 = vmin.f32 %v1517_v39, %v1518_v43 }
 0x1cf   : > { %v2684_v54 = vmin.f32 %v2681_v53, %v2682_v9 }
 0x1d0   : > { %v1521_v57 = vmin.f32 %v1519_v12, %v1520_v56 }
 0x1d1   : > { %v2685_v36 = vmin.f32 %v2683_v1, %v2684_v54 }
 0x1d2   : > { %v1522_v49 = vrot.slane %v1521_v57, 4 }
 0x1d3   : > { %v2686_v11 = vrot.slane %v2685_v36, 4 }
 0x1d4   : > { %v1523_v15 = vmin.f32 %v1521_v57, %v1522_v49 }
 0x1d5   : > { %v2687_v17 = vmin.f32 %v2685_v36, %v2686_v11 }
 0x1d6   : > { %v1524_v18 = vrot.slane %v1523_v15, 2 }
 0x1d7   : > { %v2688_v29 = vrot.slane %v2687_v17, 2 }
 0x1d8   : > { %v1525_v30 = vmin.f32 %v1523_v15, %v1524_v18 }
 0x1d9   : > { %v2689_v58 = vmin.f32 %v2687_v17, %v2688_v29 }
 0x1da   : > { %v1526_v61 = vrot.slane %v1525_v30, 1 }
 0x1db   : > { %v2690_v6 = vrot.slane %v2689_v58, 1 }
 0x1dc   : > { %v1527_v10 = vmin.f32 %v1525_v30, %v1526_v61 }
 0x1dd   : > { %v2691_v40 = vmin.f32 %v2689_v58, %v2690_v6 }
 0x1de   : > { %v1528_v55 = vmin.f32 %v1506_v8, %v1527_v10 }
 0x1df   : > { %v2692_v60 = vmin.f32 %v2670_v22, %v2691_v40 }
 0x1e0   : > { %1529 = vst [vmem:[%s4449_s8] sm:$0x1] %v1528_v55 }
 0x1e1   : > { %2693 = vst [vmem:[%s4453_s9] sm:$0x1] %v2692_v60 }
 0x1e7   : > { %v2694_v41 = vld [vmem:[%s4449_s8] sm:$0x1] }
 0x1e8   : > { %v2695_v59 = vmax.f32 %v2694_v41, 0.0  ;;  %v2707_v13 = vld [vmem:[%s4453_s9] sm:$0x1] }
 0x1e9   : > { %v2708_v45 = vmax.f32 %v2707_v13, 0.0 }
 0x1ea   : > { %3639 = vrsqrt.f32 %v2695_v59  ;;  %vm2698_vm1 = vcmp.eq.f32.partialorder %v2695_v59, inf  ;;  %v2701_v63 = vand.u32 2147483648, %v2695_v59  ;;  %vm2700_vm2 = vcmp.eq.f32.partialorder %v2695_v59, 0.0 }
 0x1eb   : > { %3641 = vrsqrt.f32 %v2708_v45  ;;  %vm2711_vm3 = vcmp.eq.f32.partialorder %v2708_v45, inf  ;;  %v2714_v48 = vand.u32 2147483648, %v2708_v45  ;;  %vm2713_vm4 = vcmp.eq.f32.partialorder %v2708_v45, 0.0 }
 0x1f4   : > { %v3640_v52 = vpop.eup %3639 }
 0x1f5   : > { %v3642_v46 = vpop.eup %3641  ;;  %v2697_v44 = vmul.f32 %v3640_v52, %v2695_v59 }
 0x1f6   : > { %v2710_v21 = vmul.f32 %v3642_v46, %v2708_v45 }
 0x1f7   : > { %v2699_v35 = vsel %vm2698_vm1, %v2695_v59, %v2697_v44 }
 0x1f8   : > { %v2702_v32 = vsel %vm2700_vm2, %v2701_v63, %v2699_v35  ;;  %v2712_v27 = vsel %vm2711_vm3, %v2708_v45, %v2710_v21 }
 0x1f9   : > { %2703 = vst [vmem:[%s4449_s8] sm:$0x1] %v2702_v32  ;;  %v2715_v19 = vsel %vm2713_vm4, %v2714_v48, %v2712_v27 }
 0x1fa   : > { %3656 = shalt.err (!%p3653_p5)
}
 0x1fb   : > { %s3657_s8 = scalar_lea.hbm %s4468_s15, 16  ;;  %s3661_s21 = scalar_lea.hbm %s4551_s4, 32 }
 0x1fc   : > { %p3658_p6 = scmp.ne.s32.totalorder %s4468_s15, %s3657_s8  ;;  %p3662_p10 = scmp.lt.u32.totalorder %s4468_s15, %s4551_s4 }
 0x1fd   : > { %p3663_p11 = scmp.lt.u32.totalorder %s3661_s21, %s3657_s8  ;;  %p3665_p13 = scmp.lt.u32.totalorder %s3657_s8, %s4468_s15 }
 0x1fe   : > { %p3659_p7 = pnand %p3658_p6, %p3828_p4 }
 0x1ff   : > { %p3664_p12 = por %p3663_p11, %p3662_p10 }
 0x200   : > { %p3660_p9 = pneg %p3659_p7 }
 0x201   : > { %p3666_p0 = por %p3665_p13, %p3664_p12 }
 0x203   : > { %p3667_p1 = pnand %p3666_p0, %p3660_p9 }
 0x205   : > { %3670 = shalt.err (!%p3667_p1)
}
 0x206   : > { %3578 = dma.vmem_to_hbm [thread:$0]  (%p3828_p4), %s4470_s11, 16, %s4468_s15, %s2718_s24   ;;  %2716 = vst [vmem:[%s4453_s9] sm:$0x1] %v2715_v19 }
 0x207   : > { %s2722_s25 = scalar_lea.sflag [#allocation5], %s4446_s7  ;;  %s3671_s29 = scalar_lea.vmem %s4477_s12, 16 }
 0x208   : > { %p3672_p2 = scmp.ne.s32.totalorder %s4477_s12, %s3671_s29  ;;  %s3757_s13 = smov [#allocation4]  }
 0x209   : > { %s3675_s8 = sshll.u32 %s3757_s13, 4  ;;  %s3676_s8 = int_to_ptr.vmem [resolvable:$false] %s3675_s8 }
 0x20a   : > { %p3673_p3 = pnand %p3672_p2, %p3828_p4  ;;  %s3677_s10 = scalar_lea.vmem %s3676_s8, 32 }
 0x20b   : > { %p3678_p6 = scmp.lt.s32.totalorder %s4477_s12, %s3676_s8  ;;  %p3679_p7 = scmp.lt.s32.totalorder %s3677_s10, %s3671_s29 }
 0x20c   : > { %p3674_p5 = pneg %p3673_p3 }
 0x20d   : > { %p3680_p9 = por %p3679_p7, %p3678_p6 }
 0x20f   : > { %p3681_p10 = pnand %p3680_p9, %p3674_p5 }
 0x211   : > { %3684 = shalt.err (!%p3681_p10)
}
 0x212   : > { %s3685_s7 = scalar_lea.hbm %s4475_s17, 16  ;;  %s3689_s15 = scalar_lea.hbm %s4552_s5, 32 }
 0x213   : > { %p3686_p11 = scmp.ne.s32.totalorder %s4475_s17, %s3685_s7  ;;  %p3690_p0 = scmp.lt.u32.totalorder %s4475_s17, %s4552_s5 }
 0x214   : > { %p3691_p1 = scmp.lt.u32.totalorder %s3689_s15, %s3685_s7  ;;  %p3693_p3 = scmp.lt.u32.totalorder %s3685_s7, %s4475_s17 }
 0x215   : > { %p3687_p12 = pnand %p3686_p11, %p3828_p4 }
 0x216   : > { %p3692_p2 = por %p3691_p1, %p3690_p0 }
 0x217   : > { %p3688_p13 = pneg %p3687_p12 }
 0x218   : > { %p3694_p5 = por %p3693_p3, %p3692_p2 }
 0x21a   : > { %p3695_p6 = pnand %p3694_p5, %p3688_p13 }
 0x21c   : > { %3698 = shalt.err (!%p3695_p6)
}
 0x21d   : > { %3579 = dma.vmem_to_hbm [thread:$0]  (%p3828_p4), %s4477_s12, 16, %s4475_s17, %s2722_s25  }
 0x21e PF: > { %p3589_p7 = scmp.ge.s32.totalorder %s3753_s23, 2  ;;  %s2760_s21 = sand.u32 1, %s3733_s18  }
 0x21f   : > { %s2761_s16 = scalar_lea.sflag [#allocation3], %s2760_s21 }
 0x220   : > { %p3583_p9 = pnand %p3589_p7, %p3835_p8 }
 0x222   : > { %3724 = dma.done.wait (!%p3583_p9), %s2761_s16, 16  }
 0x223   : > { %3726 = vsyncadd (!%p3583_p9), %s2761_s16, 4294967280  ;;  %s2769_s27 = scalar_lea.sflag [#allocation5], %s2760_s21 }
 0x224   : > { %3728 = dma.done.wait (!%p3583_p9), %s2769_s27, 16  }
 0x225   : > { %3730 = vsyncadd (!%p3583_p9), %s2769_s27, 4294967280  ;;  %s22_s23 = sadd.s32 1, %s3753_s23   ;;  %s4731_s18 = smov %s3737_s19 }
 0x226   : > { %p19_p10 = scmp.ge.s32.totalorder %s22_s23, 4   ;;  %s4732_s19 = smov %s3741_s20 }
 0x227   : > { %s4733_s20 = smov %s3841_s6  ;;  %s4734_s21 = smov %s3749_s22 }
 0x228   : > { %s4735_s22 = smov %s4737_s26  ;;  %21 = sbr.rel (!%p19_p10) target bundleno = 6 (0x6), region = 105 }
 0x22f   :  { %2773 = vsyncpa [#allocation3], 1 }
 0x230   :  { %2775 = vsyncpa [#allocation3 + $0x1], 1 }
 0x231   :  { %2776 = vsyncpa [#allocation5], 1 }
 0x232   :  { %2778 = vsyncpa [#allocation5 + $0x1], 1 }

</bundles_post_ra>
